<compile_context>
chip_gen: v7x
topology: tpu7x:2x2x1
jax: 0.10.0
libtpu: 0.0.40
codegen_flags: <defaults>
</compile_context>

<pallas_src>
import math

import jax
import jax.numpy as jnp
from jax.experimental import pallas as pl
from jax.experimental.pallas import tpu as pltpu


def _round_up(n, m):
    return ((n + m - 1) // m) * m


def _cdiv(a, b):
    return (a + b - 1) // b


def _vmem_capacity_bytes():
    # Generation-aware VMEM capacity (128 MiB on v5e/v6e, 64 MiB per TensorCore on
    # v7x).  Fall back to the most conservative figure if the query is unavailable.
    try:
        cap = int(getattr(pltpu.get_tpu_info(), "vmem_capacity_bytes"))
        if cap > 0:
            return cap
    except Exception:
        pass
    return 64 * 1024 * 1024


def ffn_kernel(x_ref, w1_ref, b1_ref, w2_ref, b2_ref, o_ref, acc_ref):
    # x_ref: (tm, Hp), w1_ref: (Hp, tf), b1_ref: (1, tf) f32,
    # w2_ref: (tf, Op), b2_ref: (1, Op) f32, o_ref: (tm, Op), acc_ref: (tm, Op) f32.
    f = pl.program_id(1)

    @pl.when(f == 0)
    def _init():
        acc_ref[...] = jnp.zeros_like(acc_ref)

    # First matmul reduces over the FULL (padded) hidden dim, so this filter-tile of
    # the intermediate is exact; bias-add + ReLU are elementwise and thus F-tileable.
    h = jnp.dot(x_ref[...], w1_ref[...], preferred_element_type=jnp.float32)
    h = jnp.maximum(h + b1_ref[...], 0.0)          # bias + ReLU in f32
    # Dropout: identity in eval mode.
    acc_ref[...] += jnp.dot(h.astype(w2_ref.dtype), w2_ref[...],
                            preferred_element_type=jnp.float32)

    @pl.when(f == pl.num_programs(1) - 1)
    def _finalize():
        o_ref[...] = (acc_ref[...] + b2_ref[...]).astype(o_ref.dtype)


def prepare_ffn_params(w1, b1, w2, b2, compute_dtype=jnp.float32):
    """Pad/cast the static weights ONCE at init time (hoisted out of the call path).

    w1: [H, F], b1: [F], w2: [F, O], b2: [O]  (weights pre-transposed vs. PyTorch).
    compute_dtype: matmul operand dtype.  Use jnp.bfloat16 on v6e/v7x for the fast MXU
    path and half the weight DMA; accumulation and bias adds stay in f32 either way.
    """
    H, F = w1.shape
    O = w2.shape[1]
    assert w2.shape[0] == F and b1.shape == (F,) and b2.shape == (O,)
    Hp, Fp, Op = _round_up(H, 128), _round_up(F, 128), _round_up(O, 128)

    def pad2(a, r, c):
        if a.shape == (r, c):
            return a
        return jnp.pad(a, ((0, r - a.shape[0]), (0, c - a.shape[1])))

    # Zero padding of the feature dims is a mathematical no-op for both Linears:
    # padded x/w1 columns contribute 0, ReLU(0)=0, padded w2 rows contribute 0, and
    # padded output columns are sliced away.
    w1_p = pad2(w1, Hp, Fp).astype(compute_dtype)
    w2_p = pad2(w2, Fp, Op).astype(compute_dtype)
    b1_p = jnp.pad(b1, (0, Fp - F)).astype(jnp.float32).reshape(1, Fp)
    b2_p = jnp.pad(b2, (0, Op - O)).astype(jnp.float32).reshape(1, Op)
    return dict(w1=w1_p, b1=b1_p, w2=w2_p, b2=b2_p,
                hidden=H, out_features=O, compute_dtype=jnp.dtype(compute_dtype))


def feed_forward_network(x, params, *, tile_m=256, tile_f=None):
    """Fused Linear -> ReLU -> Dropout(eval) -> Linear.  x: [..., hidden]."""
    H = params["hidden"]
    O = params["out_features"]
    cdtype = params["compute_dtype"]
    w1_p, b1_p, w2_p, b2_p = params["w1"], params["b1"], params["w2"], params["b2"]
    Hp, Fp = w1_p.shape
    Op = w2_p.shape[1]

    out_dtype = x.dtype
    lead = x.shape[:-1]
    x2 = x.reshape(-1, x.shape[-1])
    M = x2.shape[0]

    # Pad/cast activations only when actually needed (H already a multiple of 128 and
    # matching dtype is the common transformer case -> no extra HBM passes).
    if Hp != H:
        x2 = jnp.pad(x2, ((0, 0), (0, Hp - H)))
    if x2.dtype != cdtype:
        x2 = x2.astype(cdtype)

    in_bytes = jnp.dtype(cdtype).itemsize
    out_bytes = jnp.dtype(out_dtype).itemsize

    # ---- tiling ----------------------------------------------------------------
    cap = _vmem_capacity_bytes()
    budget = int(0.70 * cap)            # working-set planning target

    tile_m = max(8, min(int(tile_m), _round_up(M, 8)))
    tile_m = _round_up(tile_m, 8)

    def est(tm, tf):
        # Double-buffered pipeline tiles + f32 accumulator + f32 intermediate.
        return (2 * tm * Hp * in_bytes          # x row tile
                + 2 * Hp * tf * in_bytes        # w1 column tile
                + 2 * tf * Op * in_bytes        # w2 row tile
                + 2 * (tf + Op) * 4             # biases (f32)
                + 2 * tm * Op * out_bytes       # output tile
                + tm * Op * 4                   # f32 accumulator scratch
                + tm * tf * 4)                  # f32 intermediate h

    # Filter-dim tile: largest 128*d (d | Fp/128) that fits the budget.  tf must
    # divide Fp exactly: a ragged filter tile would feed undefined lanes into the
    # accumulating second matmul, so raggedness is only allowed on the M axis.
    q = Fp // 128
    candidates = sorted((128 * d for d in range(1, q + 1) if q % d == 0), reverse=True)
    if tile_f is not None:
        candidates = [c for c in candidates if c <= _round_up(int(tile_f), 128)] or [128]
    tf = candidates[-1]
    for c in candidates:
        tf = c
        if est(tile_m, tf) <= budget:
            break

    # If streaming F-tiles alone is not enough, shrink the row tile (128 still fills
    # the MXU on every generation: exactly on v5e's 4x128^2, half of v6e/v7x 2x256^2).
    while tile_m > 128 and est(tile_m, tf) > budget:
        tile_m = max(8, _round_up(tile_m // 2, 8))
    for c in candidates:                 # re-confirm tf with the (possibly) smaller tm
        if c <= tf and est(tile_m, c) <= budget:
            tf = c
            break
    # TODO(synk): if est(tile_m, tf) still exceeds the budget (enormous Hp or Op), the
    # hidden/output dims would need their own grid axes as well.

    # v7x has 2 TensorCores; give the "parallel" M axis >= 2 steps when M allows.
    while _cdiv(M, tile_m) < 2 and tile_m > 128:
        tile_m = max(8, _round_up(tile_m // 2, 8))

    n_m = _cdiv(M, tile_m)               # ragged last row-block is masked by Pallas
    n_f = Fp // tf

    need = est(tile_m, tf)
    vmem_limit = int(min(int(0.80 * cap),
                         max(int(1.3 * need) + (2 << 20), 32 * 1024 * 1024)))

    cost = pl.CostEstimate(
        flops=int(2 * M * (Hp * Fp + Fp * Op)),
        transcendentals=0,
        bytes_accessed=int(M * Hp * in_bytes + (Hp * Fp + Fp * Op) * in_bytes
                           + M * Op * out_bytes + (Fp + Op) * 4))

    out = pl.pallas_call(
        ffn_kernel,
        out_shape=jax.ShapeDtypeStruct((M, Op), out_dtype),
        grid=(n_m, n_f),
        in_specs=[
            pl.BlockSpec((tile_m, Hp), lambda i, f: (i, 0)),   # x (constant in f -> DMA'd once per i)
            pl.BlockSpec((Hp, tf), lambda i, f: (0, f)),       # w1 column tile (streamed over f)
            pl.BlockSpec((1, tf), lambda i, f: (0, f)),        # b1 tile (f32)
            pl.BlockSpec((tf, Op), lambda i, f: (f, 0)),       # w2 row tile (streamed over f)
            pl.BlockSpec((1, Op), lambda i, f: (0, 0)),        # b2 (f32, constant -> DMA'd once)
        ],
        out_specs=pl.BlockSpec((tile_m, Op), lambda i, f: (i, 0)),
        scratch_shapes=[pltpu.VMEM((tile_m, Op), jnp.float32)],
        compiler_params=pltpu.CompilerParams(
            dimension_semantics=("parallel", "arbitrary"),
            vmem_limit_bytes=vmem_limit),
        cost_estimate=cost,
    )(x2, w1_p, b1_p, w2_p, b2_p)

    if Op != O:
        out = out[:, :O]
    return out.reshape(lead + (O,))


def xavier_uniform(key, fan_in, fan_out, dtype=jnp.float32):
    # Matches torch.nn.init.xavier_uniform_ bound: sqrt(6 / (fan_in + fan_out)).
    bound = math.sqrt(6.0 / (fan_in + fan_out))
    # Returned in [in_features, out_features] layout (transposed vs. PyTorch storage).
    return jax.random.uniform(key, (fan_in, fan_out), dtype=dtype,
                              minval=-bound, maxval=bound)


if __name__ == "__main__":
    # Small shapes consistent with the module's forward: x [B, S, H]
    B, S, H, FILT = 2, 8, 32, 64
    dropout_rate = 0.1   # unused at inference (identity)
    OUT = H              # output_size=None -> layer2 maps back to hidden_size

    key = jax.random.PRNGKey(0)
    kx, k1, k2 = jax.random.split(key, 3)

    x = jax.random.normal(kx, (B, S, H), dtype=jnp.float32)

    # layer1: Linear(H, FILT) — xavier_uniform weight, zero bias
    w1 = xavier_uniform(k1, H, FILT)          # [H, FILT] (pre-transposed)
    b1 = jnp.zeros((FILT,), jnp.float32)
    # layer2: Linear(FILT, OUT)
    w2 = xavier_uniform(k2, FILT, OUT)        # [FILT, OUT]
    b2 = jnp.zeros((OUT,), jnp.float32)

    ref = (jnp.maximum(x.reshape(-1, H) @ w1 + b1, 0.0) @ w2 + b2).reshape(B, S, OUT)

    # f32 path (exact-ish vs reference).  Weight pad/cast is hoisted to init time.
    params_f32 = prepare_ffn_params(w1, b1, w2, b2, compute_dtype=jnp.float32)
    fwd_f32 = jax.jit(lambda xx: feed_forward_network(xx, params_f32))
    out = jax.block_until_ready(fwd_f32(x))
    assert out.shape == (B, S, OUT)
    assert jnp.allclose(out, ref, atol=1e-5, rtol=1e-5), "f32 mismatch vs reference"

    # bf16 compute path (recommended on v6e/v7x): bf16 operands, f32 accumulation/bias.
    params_bf16 = prepare_ffn_params(w1, b1, w2, b2, compute_dtype=jnp.bfloat16)
    out_bf16 = jax.block_until_ready(
        jax.jit(lambda xx: feed_forward_network(xx, params_bf16))(x))
    assert jnp.allclose(out_bf16, ref, atol=1e-1, rtol=1e-1), "bf16 mismatch vs reference"

    print("KERNEL_OK")
</pallas_src>

<mosaic_0001>
module attributes {stable_mosaic.version = 11 : i64} {
  func.func @ffn_kernel(%arg0: i32, %arg1: i32, %arg2: memref<16x128xf32, #tpu.memory_space<vmem>>, %arg3: memref<128x128xf32, #tpu.memory_space<vmem>>, %arg4: memref<1x128xf32, #tpu.memory_space<vmem>>, %arg5: memref<128x128xf32, #tpu.memory_space<vmem>>, %arg6: memref<1x128xf32, #tpu.memory_space<vmem>>, %arg7: memref<16x128xf32, #tpu.memory_space<vmem>>, %arg8: memref<16x128xf32, #tpu.memory_space<vmem>>) attributes {dimension_semantics = [#tpu.dimension_semantics<parallel>, #tpu.dimension_semantics<arbitrary>], iteration_bounds = array<i64: 1, 1>, scalar_prefetch = 0 : i64, scratch_operands = 1 : i64, tpu.core_type = #tpu.core_type<tc>, window_params = [{transform_indices = @transform_0, window_bounds = array<i64: 16, 128>}, {transform_indices = @transform_1, window_bounds = array<i64: 128, 128>}, {transform_indices = @transform_2, window_bounds = array<i64: 1, 128>}, {transform_indices = @transform_3, window_bounds = array<i64: 128, 128>}, {pipeline_mode = #tpu.pipeline_mode<synchronous>, transform_indices = @transform_4, window_bounds = array<i64: 1, 128>}, {transform_indices = @transform_5, window_bounds = array<i64: 16, 128>}]} {
    %c0_i32 = arith.constant 0 : i32
    %0 = arith.cmpi eq, %arg1, %c0_i32 : i32
    %1 = arith.extui %0 : i1 to i32
    %c0_i32_0 = arith.constant 0 : i32
    %2 = arith.cmpi ne, %1, %c0_i32_0 : i32
    scf.if %2 {
      %cst_16 = arith.constant 0.000000e+00 : f32
      %19 = vector.broadcast %cst_16 : f32 to vector<16x128xf32>
      %c0_17 = arith.constant 0 : index
      %c0_18 = arith.constant 0 : index
      %20 = vector.load %arg8[%c0_17, %c0_18] : memref<16x128xf32, #tpu.memory_space<vmem>>, vector<16x128xf32>
      tpu.vector_store %arg8[%c0_17, %c0_18], %19 {strides = array<i32>} : memref<16x128xf32, #tpu.memory_space<vmem>>, vector<16x128xf32>,
    } else {
    }
    %c0 = arith.constant 0 : index
    %c0_1 = arith.constant 0 : index
    %3 = vector.load %arg2[%c0, %c0_1] : memref<16x128xf32, #tpu.memory_space<vmem>>, vector<16x128xf32>
    %c0_2 = arith.constant 0 : index
    %c0_3 = arith.constant 0 : index
    %4 = vector.load %arg3[%c0_2, %c0_3] : memref<128x128xf32, #tpu.memory_space<vmem>>, vector<128x128xf32>
    %cst = arith.constant dense<0.000000e+00> : vector<16x128xf32>
    %5 = tpu.matmul %3, %4, %cst {dimension_numbers = #tpu.dot_dimension_numbers<[1], [0], [0], [1], [0, 0, 1, 1], [], []>} : vector<16x128xf32>, vector<128x128xf32>, vector<16x128xf32> -> vector<16x128xf32>
    %c0_4 = arith.constant 0 : index
    %c0_5 = arith.constant 0 : index
    %6 = vector.load %arg4[%c0_4, %c0_5] : memref<1x128xf32, #tpu.memory_space<vmem>>, vector<1x128xf32>
    %7 = vector.broadcast %6 : vector<1x128xf32> to vector<16x128xf32>
    %8 = arith.addf %5, %7 : vector<16x128xf32>
    %cst_6 = arith.constant 0.000000e+00 : f32
    %9 = vector.broadcast %cst_6 : f32 to vector<16x128xf32>
    %10 = arith.maximumf %8, %9 : vector<16x128xf32>
    %c0_7 = arith.constant 0 : index
    %c0_8 = arith.constant 0 : index
    %11 = vector.load %arg8[%c0_7, %c0_8] : memref<16x128xf32, #tpu.memory_space<vmem>>, vector<16x128xf32>
    %c0_9 = arith.constant 0 : index
    %c0_10 = arith.constant 0 : index
    %12 = vector.load %arg5[%c0_9, %c0_10] : memref<128x128xf32, #tpu.memory_space<vmem>>, vector<128x128xf32>
    %cst_11 = arith.constant dense<0.000000e+00> : vector<16x128xf32>
    %13 = tpu.matmul %10, %12, %cst_11 {dimension_numbers = #tpu.dot_dimension_numbers<[1], [0], [0], [1], [0, 0, 1, 1], [], []>} : vector<16x128xf32>, vector<128x128xf32>, vector<16x128xf32> -> vector<16x128xf32>
    %14 = arith.addf %11, %13 : vector<16x128xf32>
    %c0_12 = arith.constant 0 : index
    %c0_13 = arith.constant 0 : index
    %15 = vector.load %arg8[%c0_12, %c0_13] : memref<16x128xf32, #tpu.memory_space<vmem>>, vector<16x128xf32>
    tpu.vector_store %arg8[%c0_12, %c0_13], %14 {strides = array<i32>} : memref<16x128xf32, #tpu.memory_space<vmem>>, vector<16x128xf32>,
    %c0_i32_14 = arith.constant 0 : i32
    %16 = arith.cmpi eq, %arg1, %c0_i32_14 : i32
    %17 = arith.extui %16 : i1 to i32
    %c0_i32_15 = arith.constant 0 : i32
    %18 = arith.cmpi ne, %17, %c0_i32_15 : i32
    scf.if %18 {
      %c0_16 = arith.constant 0 : index
      %c0_17 = arith.constant 0 : index
      %19 = vector.load %arg8[%c0_16, %c0_17] : memref<16x128xf32, #tpu.memory_space<vmem>>, vector<16x128xf32>
      %c0_18 = arith.constant 0 : index
      %c0_19 = arith.constant 0 : index
      %20 = vector.load %arg6[%c0_18, %c0_19] : memref<1x128xf32, #tpu.memory_space<vmem>>, vector<1x128xf32>
      %21 = vector.broadcast %20 : vector<1x128xf32> to vector<16x128xf32>
      %22 = arith.addf %19, %21 : vector<16x128xf32>
      %c0_20 = arith.constant 0 : index
      %c0_21 = arith.constant 0 : index
      %23 = vector.load %arg7[%c0_20, %c0_21] : memref<16x128xf32, #tpu.memory_space<vmem>>, vector<16x128xf32>
      tpu.vector_store %arg7[%c0_20, %c0_21], %22 {strides = array<i32>} : memref<16x128xf32, #tpu.memory_space<vmem>>, vector<16x128xf32>,
    } else {
    }
    return
  }
  func.func @transform_0(%arg0: i32, %arg1: i32) -> (i32, i32) {
    %c0_i32 = arith.constant 0 : i32
    %c0_i32_0 = arith.constant 0 : i32
    return %arg0, %c0_i32 : i32, i32
  }
  func.func @transform_1(%arg0: i32, %arg1: i32) -> (i32, i32) {
    %c0_i32 = arith.constant 0 : i32
    %c0_i32_0 = arith.constant 0 : i32
    return %c0_i32, %arg1 : i32, i32
  }
  func.func @transform_2(%arg0: i32, %arg1: i32) -> (i32, i32) {
    %c0_i32 = arith.constant 0 : i32
    %c0_i32_0 = arith.constant 0 : i32
    return %c0_i32, %arg1 : i32, i32
  }
  func.func @transform_3(%arg0: i32, %arg1: i32) -> (i32, i32) {
    %c0_i32 = arith.constant 0 : i32
    %c0_i32_0 = arith.constant 0 : i32
    return %arg1, %c0_i32 : i32, i32
  }
  func.func @transform_4(%arg0: i32, %arg1: i32) -> (i32, i32) {
    %c0_i32 = arith.constant 0 : i32
    %c0_i32_0 = arith.constant 0 : i32
    %c0_i32_1 = arith.constant 0 : i32
    return %c0_i32, %c0_i32_0 : i32, i32
  }
  func.func @transform_5(%arg0: i32, %arg1: i32) -> (i32, i32) {
    %c0_i32 = arith.constant 0 : i32
    %c0_i32_0 = arith.constant 0 : i32
    return %arg0, %c0_i32 : i32, i32
  }
}

</mosaic_0001>

<bundles_post_ra>
// kernel: _lambda_.1
= control target key start
LH: loop header
LB: loop body
LE: loop exit
PB: predicated region body
PF: predicated region fallthrough
CT: control target
= control target key end

     0   :  { %10 = vsyncpa [#allocation4], 0  ;;  %s575_s0 = inlined_call_operand.vmem [shape: f32[16,128], index: 0, kind: input, shape index: {}]   ;;  %s576_s1 = inlined_call_operand.hbm [shape: f32[128,128], index: 1, kind: input, shape index: {}]   ;;  %s577_s2 = inlined_call_operand.vmem [shape: f32[1,128], index: 2, kind: input, shape index: {}, may-alias: {2,4}]   ;;  %s578_s3 = inlined_call_operand.hbm [shape: f32[128,128], index: 3, kind: input, shape index: {}]   ;;  %s579_s4 = inlined_call_operand.vmem [shape: f32[1,128], index: 4, kind: input, shape index: {}, may-alias: {2,4}]   ;;  %s580_s5 = inlined_call_operand.vmem [shape: f32[16,128], index: 5, kind: output, shape index: {}]  }
   0x1   :  { %11 = vsyncpa [#allocation6], 0  ;;  %s499_s18 = smov [#allocation3]   ;;  %s451_s22 = scalar_lea.hbm %s576_s1, 2048 }
   0x2   :  { %s19_s19 = sshll.u32 %s499_s18, 4  ;;  %p452_p0 = scmp.ne.s32.totalorder %s576_s1, %s451_s22  ;;  %s20_s19 = int_to_ptr.vmem [resolvable:$true] %s19_s19 }
   0x3   :  { %p455_p1 = scmp.lt.u32.totalorder %s451_s22, %s576_s1 }
   0x5   :  { %p457_p2 = pnand %p455_p1, %p452_p0 }
   0x7   :  { %460 = shalt.err (!%p457_p2)
}
   0x8   :  { %s461_s27 = scalar_lea.vmem %s20_s19, 2048  ;;  %p466_p4 = scmp.lt.s32.totalorder %s20_s19, %s20_s19 }
   0x9   :  { %p462_p3 = scmp.ne.s32.totalorder %s20_s19, %s461_s27  ;;  %p467_p5 = scmp.lt.s32.totalorder %s461_s27, %s461_s27 }
   0xb   :  { %p468_p6 = por %p467_p5, %p466_p4 }
   0xd   :  { %p469_p7 = pnand %p468_p6, %p462_p3 }
   0xf   :  { %472 = shalt.err (!%p469_p7)
}
  0x10   :  { %s500_s28 = smov 128   ;;  %s501_s29 = smov 8  }
  0x11   :  { %25 = dma.hbm_to_vmem [thread:$0]  %s576_s1, 2048, %s20_s19, [#allocation4], %s500_s28, %s500_s28, %s501_s29  }
  0x12   :  { %s502_s7 = smov [#allocation5]   ;;  %s473_s11 = scalar_lea.hbm %s578_s3, 2048 }
  0x13   :  { %s33_s8 = sshll.u32 %s502_s7, 4  ;;  %p474_p8 = scmp.ne.s32.totalorder %s578_s3, %s473_s11  ;;  %s34_s8 = int_to_ptr.vmem [resolvable:$true] %s33_s8 }
  0x14   :  { %p477_p9 = scmp.lt.u32.totalorder %s473_s11, %s578_s3 }
  0x16   :  { %p479_p10 = pnand %p477_p9, %p474_p8 }
  0x18   :  { %482 = shalt.err (!%p479_p10)
}
  0x19   :  { %s483_s16 = scalar_lea.vmem %s34_s8, 2048  ;;  %p488_p12 = scmp.lt.s32.totalorder %s34_s8, %s34_s8 }
  0x1a   :  { %p484_p11 = scmp.ne.s32.totalorder %s34_s8, %s483_s16  ;;  %p489_p13 = scmp.lt.s32.totalorder %s483_s16, %s483_s16 }
  0x1c   :  { %p490_p0 = por %p489_p13, %p488_p12 }
  0x1e   :  { %p491_p1 = pnand %p490_p0, %p484_p11 }
  0x20   :  { %494 = shalt.err (!%p491_p1)
}
  0x21   :  { %39 = dma.hbm_to_vmem [thread:$0]  %s578_s3, 2048, %s34_s8, [#allocation6], %s500_s28, %s500_s28, %s501_s29  }
  0x22   :  { %495 = dma.done.wait [#allocation4], 2048  }
  0x23   :  { %496 = vsyncadd [#allocation4], 4294965248 }
  0x24   :  { %497 = dma.done.wait [#allocation6], 2048  }
  0x25   :  { %498 = vsyncadd [#allocation6], 4294965248  ;;  %v56_v0 = vld [vmem:[#allocation3] sm:$0xff]  ;;  %v57_v1 = vld [vmem:[#allocation3 + $0x8] sm:$0xff] }
  0x26   :  { %v58_v2 = vld [vmem:[#allocation3 + $0x10] sm:$0xff]  ;;  %v383_v3 = vpack.c.bf16 %v57_v1, %v56_v0  ;;  %v59_v4 = vld [vmem:[#allocation3 + $0x18] sm:$0xff]  ;;  %v60_v6 = vld [vmem:[#allocation3 + $0x20] sm:$0xff] }
  0x27   :  { %v387_v5 = vpack.c.bf16 %v59_v4, %v58_v2  ;;  %v61_v7 = vld [vmem:[#allocation3 + $0x28] sm:$0xff]  ;;  %v62_v9 = vld [vmem:[#allocation3 + $0x30] sm:$0xff]  ;;  %v63_v10 = vld [vmem:[#allocation3 + $0x38] sm:$0xff] }
  0x28   :  { %384 = vmatprep.subr.bf16.mxu0 %v383_v3  ;;  %v391_v8 = vpack.c.bf16 %v61_v7, %v60_v6  ;;  %v54_v11 = vld [vmem:[%s575_s0] sm:$0xff]  ;;  %v159_v13 = vld [vmem:[#allocation5 + $0x8] sm:$0xff]  ;;  %v160_v14 = vld [vmem:[#allocation5 + $0x10] sm:$0xff]  ;;  %v395_v20 = vpack.c.bf16 %v63_v10, %v62_v9 }
  0x29   :  { %386 = vmatpush3.bf16.msra.mxu0 %v383_v3  ;;  %345 = vmatprep.mubr.f32.mxu0 %v54_v11  ;;  %v158_v12 = vld [vmem:[#allocation5] sm:$0xff]  ;;  %v161_v16 = vld [vmem:[#allocation5 + $0x18] sm:$0xff]  ;;  %v163_v19 = vld [vmem:[#allocation5 + $0x28] sm:$0xff] }
  0x2a   :  { %388 = vmatprep.subr.bf16.mxu0 %v387_v5  ;;  %v415_v15 = vpack.c.bf16 %v159_v13, %v158_v12  ;;  %v419_v17 = vpack.c.bf16 %v161_v16, %v160_v14  ;;  %v162_v18 = vld [vmem:[#allocation5 + $0x20] sm:$0xff]  ;;  %v65_v22 = vld [vmem:[#allocation3 + $0x48] sm:$0xff]  ;;  %v164_v24 = vld [vmem:[#allocation5 + $0x30] sm:$0xff] }
  0x2b   :  { %v64_v21 = vld [vmem:[#allocation3 + $0x40] sm:$0xff]  ;;  %v423_v23 = vpack.c.bf16 %v163_v19, %v162_v18  ;;  %v165_v25 = vld [vmem:[#allocation5 + $0x38] sm:$0xff]  ;;  %v66_v27 = vld [vmem:[#allocation3 + $0x50] sm:$0xff] }
  0x2c   :  { %416 = vmatprep.subr.bf16.mxu1 %v415_v15  ;;  %v399_v26 = vpack.c.bf16 %v65_v22, %v64_v21  ;;  %v67_v28 = vld [vmem:[#allocation3 + $0x58] sm:$0xff]  ;;  %v427_v29 = vpack.c.bf16 %v165_v25, %v164_v24  ;;  %v166_v30 = vld [vmem:[#allocation5 + $0x40] sm:$0xff]  ;;  %v167_v31 = vld [vmem:[#allocation5 + $0x48] sm:$0xff] }
  0x2d   :  { %390 = vmatpush3.bf16.msra.mxu0 %v387_v5  ;;  %418 = vmatpush3.bf16.msra.mxu1 %v415_v15  ;;  %v403_v32 = vpack.c.bf16 %v67_v28, %v66_v27  ;;  %v68_v33 = vld [vmem:[#allocation3 + $0x60] sm:$0xff]  ;;  %v69_v34 = vld [vmem:[#allocation3 + $0x68] sm:$0xff]  ;;  %v431_v35 = vpack.c.bf16 %v167_v31, %v166_v30  ;;  %v168_v36 = vld [vmem:[#allocation5 + $0x50] sm:$0xff] }
  0x2e   :  { %392 = vmatprep.subr.bf16.mxu0 %v391_v8  ;;  %420 = vmatprep.subr.bf16.mxu1 %v419_v17  ;;  %v169_v37 = vld [vmem:[#allocation5 + $0x58] sm:$0xff]  ;;  %v407_v38 = vpack.c.bf16 %v69_v34, %v68_v33  ;;  %v70_v39 = vld [vmem:[#allocation3 + $0x70] sm:$0xff]  ;;  %v170_v42 = vld [vmem:[#allocation5 + $0x60] sm:$0xff] }
  0x2f   :  { %v71_v40 = vld [vmem:[#allocation3 + $0x78] sm:$0xff]  ;;  %v435_v41 = vpack.c.bf16 %v169_v37, %v168_v36  ;;  %v171_v43 = vld [vmem:[#allocation5 + $0x68] sm:$0xff]  ;;  %v172_v47 = vld [vmem:[#allocation5 + $0x70] sm:$0xff] }
  0x30   :  { %v411_v44 = vpack.c.bf16 %v71_v40, %v70_v39  ;;  %v439_v45 = vpack.c.bf16 %v171_v43, %v170_v42  ;;  %v55_v46 = vld [vmem:[%s575_s0 + $0x8] sm:$0xff]  ;;  %v173_v48 = vld [vmem:[#allocation5 + $0x78] sm:$0xff]  ;;  %v275_v50 = vld [vmem:[%s577_s2] ss:$0 sm:$0xff] }
  0x31   :  { %394 = vmatpush3.bf16.msra.mxu0 %v391_v8  ;;  %422 = vmatpush3.bf16.msra.mxu1 %v419_v17  ;;  %v443_v49 = vpack.c.bf16 %v173_v48, %v172_v47  ;;  %v276_v57 = vld [vmem:[%s579_s4] ss:$0 sm:$0xff] }
  0x32   :  { %396 = vmatprep.subr.bf16.mxu0 %v395_v20  ;;  %424 = vmatprep.subr.bf16.mxu1 %v423_v23 }
  0x35   :  { %398 = vmatpush3.bf16.msra.mxu0 %v395_v20  ;;  %426 = vmatpush3.bf16.msra.mxu1 %v423_v23 }
  0x36   :  { %400 = vmatprep.subr.bf16.mxu0 %v399_v26  ;;  %428 = vmatprep.subr.bf16.mxu1 %v427_v29 }
  0x39   :  { %402 = vmatpush3.bf16.msra.mxu0 %v399_v26  ;;  %430 = vmatpush3.bf16.msra.mxu1 %v427_v29 }
  0x3a   :  { %404 = vmatprep.subr.bf16.mxu0 %v403_v32  ;;  %432 = vmatprep.subr.bf16.mxu1 %v431_v35 }
  0x3d   :  { %406 = vmatpush3.bf16.msra.mxu0 %v403_v32  ;;  %434 = vmatpush3.bf16.msra.mxu1 %v431_v35 }
  0x3e   :  { %408 = vmatprep.subr.bf16.mxu0 %v407_v38  ;;  %436 = vmatprep.subr.bf16.mxu1 %v435_v41 }
  0x41   :  { %410 = vmatpush3.bf16.msra.mxu0 %v407_v38  ;;  %438 = vmatpush3.bf16.msra.mxu1 %v435_v41 }
  0x42   :  { %412 = vmatprep.subr.bf16.mxu0 %v411_v44  ;;  %440 = vmatprep.subr.bf16.mxu1 %v439_v45 }
  0x45   :  { %414 = vmatpush3.bf16.msra.mxu0 %v411_v44  ;;  %442 = vmatpush3.bf16.msra.mxu1 %v439_v45 }
  0x46   :  { %444 = vmatprep.subr.bf16.mxu1 %v443_v49 }
  0x48   :  { %346 = vmatmul.mubr.f32.vlgmr.msra.gmra.mrb[0].mxu0 %v55_v46 }
  0x49   :  { %446 = vmatpush3.bf16.msra.mxu1 %v443_v49 }
 0x11b   :  { %v347_v51 = vpop.f32.mrb[0].mxu0 }
 0x11c   :  { %v151_v52 = vadd.f32 %v347_v51, %v275_v50  ;;  %v145_v53 = vpop.f32.mrb[1].mxu0 }
 0x11d   :  { %v146_v54 = vadd.f32 %v275_v50, %v145_v53 }
 0x11e   :  { %v155_v56 = vmax.f32 %v151_v52, 0.0 }
 0x11f   :  { %v154_v55 = vmax.f32 %v146_v54, 0.0 }
 0x121   :  { %380 = vmatprep.mubr.f32.mxu1 %v154_v55 }
 0x122   :  { %381 = vmatmul.mubr.f32.vlgmr.msra.gmra.mrb[0].mxu1 %v155_v56 }
 0x1f5   :  { %v382_v58 = vpop.f32.mrb[0].mxu1 }
 0x1f6   :  { %v266_v59 = vadd.f32 %v382_v58, %v276_v57  ;;  %v240_v60 = vpop.f32.mrb[1].mxu1 }
 0x1f7   :  { %v265_v61 = vadd.f32 %v276_v57, %v240_v60 }
 0x1f8   :  { %268 = vst [vmem:[%s580_s5 + $0x8] sm:$0xff] %v266_v59 }
 0x1f9   :  { %267 = vst [vmem:[%s580_s5] sm:$0xff] %v265_v61 }
 0x1fa   :  { %273 = vsyncpa [#allocation4], 1 }
 0x1fb   :  { %274 = vsyncpa [#allocation6], 1 }

</bundles_post_ra>
